<compile_context>
chip_gen: v5e
topology: v5e:2x2
jax: 0.10.0
libtpu: 0.0.40
codegen_flags: <defaults>
</compile_context>

<pallas_src>
import functools

import jax
import jax.numpy as jnp
from jax.experimental import pallas as pl
from jax.experimental.pallas import tpu as pltpu


def _round_up(a, b):
    return (a + b - 1) // b * b


def _stage1_kernel(x_ref, wlp_ref, blp_ref, wrt_ref, hidden_ref, psum_ref, *,
                   use_relu, ne, tm, valid_rows, compute_dtype, approx_recip):
    # Cast the (f32) input tile to the compute dtype INSIDE the kernel, under the DMA.
    xv = x_ref[...].astype(compute_dtype)

    # hidden = non_linear(x @ W_lp + b_lp)   (compute_dtype operands, f32 MXU accumulation)
    h = jnp.dot(xv, wlp_ref[...], preferred_element_type=jnp.float32)
    h = h + blp_ref[...]
    if use_relu:
        h = jnp.maximum(h, 0.0)
    h_c = h.astype(hidden_ref.dtype)
    hidden_ref[...] = h_c

    # Router logits over the lane-padded expert axis; mask out padded experts.
    logits = jnp.dot(h_c, wrt_ref[...], preferred_element_type=jnp.float32)
    ne_pad = wrt_ref.shape[1]
    if ne_pad != ne:
        lane = jax.lax.broadcasted_iota(jnp.int32, logits.shape, 1)
        logits = jnp.where(lane < ne, logits, -1e30)

    m = jnp.max(logits, axis=-1, keepdims=True)
    e = jnp.exp(logits - m)
    denom = jnp.sum(e, axis=-1, keepdims=True)
    # EUP reciprocal: approx in the bf16 path (free slot), exact in the f32 path.
    probs = e * pl.reciprocal(denom, approx=approx_recip)

    # Zero the contribution of rows that are padding of the flattened token axis
    # (ragged last tile of the pl.cdiv grid).
    if valid_rows is not None:
        row = jax.lax.broadcasted_iota(jnp.int32, (tm, 1), 0) + pl.program_id(0) * tm
        probs = jnp.where(row < valid_rows, probs, 0.0)

    # Per-tile partial sum of routing probabilities -> this tile's own output row.
    psum_ref[...] = jnp.sum(probs, axis=0).reshape(psum_ref.shape)


def _stage2_kernel(hidden_ref, w_ref, out_ref):
    # Pure GEMM: out = hidden @ combined_hp (combine already hoisted to JAX glue).
    out_ref[...] = jnp.dot(hidden_ref[...], w_ref[...],
                           preferred_element_type=jnp.float32).astype(out_ref.dtype)


def lily_adapter_forward(x, w_lp, b_lp, w_router, hps, *, mlp=False, tm=1024, tn=1024,
                         compute_dtype=jnp.bfloat16, out_dtype=None):
    """x: [B, S, in_dim] -> [B, S, out_dim] (out_dtype, default = x.dtype)."""
    B, S, in_dim = x.shape
    hidden_dim = w_lp.shape[1]
    ne, _, out_dim = hps.shape
    M = B * S
    out_dtype = x.dtype if out_dtype is None else out_dtype

    x_bytes = jnp.dtype(x.dtype).itemsize
    c_bytes = jnp.dtype(compute_dtype).itemsize
    o_bytes = jnp.dtype(out_dtype).itemsize

    # ---- token tile ----
    # Keep the double-buffered f32 x tile under ~16 MiB of VMEM regardless of in_dim.
    tm_budget = max(16, ((8 * 1024 * 1024) // max(in_dim * x_bytes, 1)) // 16 * 16)
    tm_eff = min(_round_up(tm, 16), _round_up(M, 16), tm_budget)
    # v7x: make sure there are >=2 tiles so the "parallel" axis shards across both TCs.
    if M > 16:
        tm_eff = min(tm_eff, _round_up(pl.cdiv(M, 2), 16))
    tm_eff = max(tm_eff, 16)
    num_tiles = pl.cdiv(M, tm_eff)
    valid_rows = M if (M % tm_eff) != 0 else None

    # Lane-pad the expert axis so the per-tile prob-sum output slab is lane dense.
    ne_pad = _round_up(ne, 128)

    # No wrapper-side pad/cast of x: feed the raw f32 tokens, cast happens in-kernel.
    x2 = x.reshape(M, in_dim)

    wlp_c = w_lp.astype(compute_dtype)
    blp_c = b_lp.reshape(1, hidden_dim).astype(jnp.float32)
    wrt_pad = jnp.zeros((hidden_dim, ne_pad), compute_dtype)
    wrt_pad = wrt_pad.at[:, :ne].set(jnp.transpose(w_router).astype(compute_dtype))

    approx_recip = jnp.dtype(compute_dtype) != jnp.dtype(jnp.float32)
    vmem_limit = 40 * 1024 * 1024  # > v5e's 16 MiB scoped default, < v7x's 64 MiB physical

    s1_cost = pl.CostEstimate(
        flops=2 * M * in_dim * hidden_dim + 2 * M * hidden_dim * ne_pad,
        transcendentals=M * ne_pad,
        bytes_accessed=(M * in_dim * x_bytes + M * hidden_dim * c_bytes
                        + in_dim * hidden_dim * c_bytes + hidden_dim * ne_pad * c_bytes
                        + num_tiles * ne_pad * 4))

    hidden, psum_partial = pl.pallas_call(
        functools.partial(_stage1_kernel, use_relu=mlp, ne=ne, tm=tm_eff,
                          valid_rows=valid_rows, compute_dtype=compute_dtype,
                          approx_recip=approx_recip),
        out_shape=(
            jax.ShapeDtypeStruct((M, hidden_dim), compute_dtype),
            jax.ShapeDtypeStruct((num_tiles, 1, ne_pad), jnp.float32),
        ),
        grid=(num_tiles,),
        in_specs=[
            pl.BlockSpec((tm_eff, in_dim), lambda i: (i, 0)),
            pl.BlockSpec((in_dim, hidden_dim), lambda i: (0, 0)),
            pl.BlockSpec((1, hidden_dim), lambda i: (0, 0)),
            pl.BlockSpec((hidden_dim, ne_pad), lambda i: (0, 0)),
        ],
        out_specs=(
            pl.BlockSpec((tm_eff, hidden_dim), lambda i: (i, 0)),
            pl.BlockSpec((1, 1, ne_pad), lambda i: (i, 0, 0)),
        ),
        compiler_params=pltpu.CompilerParams(
            dimension_semantics=("parallel",),
            vmem_limit_bytes=vmem_limit),
        cost_estimate=s1_cost,
    )(x2, wlp_c, blp_c, wrt_pad)

    # Global expert probabilities: tiny reduction (padded rows / lanes are exact zeros).
    expert_probs = psum_partial.sum(axis=(0, 1))[:ne] / jnp.float32(M)

    # Hoisted expert combine: one tiny [ne, hidden, out] contraction, kept in f32.
    combined = jnp.einsum('e,eio->io', expert_probs,
                          hps.astype(jnp.float32)).astype(compute_dtype)

    # ---- stage 2: out_dim tiling keeps VMEM bounded for large out_dim (v7x: 64 MiB). ----
    if out_dim % 128 == 0 and out_dim > tn:
        tn_eff = _round_up(tn, 128)
    else:
        tn_eff = out_dim
    n_tiles = pl.cdiv(out_dim, tn_eff)

    s2_cost = pl.CostEstimate(
        flops=2 * M * hidden_dim * out_dim,
        transcendentals=0,
        bytes_accessed=(M * hidden_dim * c_bytes + hidden_dim * out_dim * c_bytes
                        + M * out_dim * o_bytes))

    out = pl.pallas_call(
        _stage2_kernel,
        out_shape=jax.ShapeDtypeStruct((M, out_dim), out_dtype),
        grid=(num_tiles, n_tiles),
        in_specs=[
            pl.BlockSpec((tm_eff, hidden_dim), lambda i, j: (i, 0)),
            pl.BlockSpec((hidden_dim, tn_eff), lambda i, j: (0, j)),
        ],
        out_specs=pl.BlockSpec((tm_eff, tn_eff), lambda i, j: (i, j)),
        compiler_params=pltpu.CompilerParams(
            dimension_semantics=("parallel", "parallel"),
            vmem_limit_bytes=vmem_limit),
        cost_estimate=s2_cost,
    )(hidden, combined)

    return out.reshape(B, S, out_dim)


def lily_adapter_reference(x, w_lp, b_lp, w_router, hps, *, mlp=False):
    hidden = x @ w_lp + b_lp
    if mlp:
        hidden = jnp.maximum(hidden, 0.0)
    logits = hidden @ w_router.T
    probs = jax.nn.softmax(logits, axis=-1)
    expert_p = probs.mean(axis=(0, 1))
    combined = jnp.einsum('e,eio->io', expert_p, hps)
    return hidden @ combined


if __name__ == "__main__":
    key = jax.random.PRNGKey(0)
    B, S = 2, 8
    in_dim, hidden_dim, out_dim, ne = 16, 32, 16, 4

    k1, k2, k3, k4, k5 = jax.random.split(key, 5)
    x = jax.random.normal(k1, (B, S, in_dim), jnp.float32)
    # Deterministic synthetic parameters (no checkpoint load).
    w_lp = jax.random.normal(k2, (in_dim, hidden_dim), jnp.float32) * 0.1      # lp weight
    b_lp = jax.random.normal(k3, (hidden_dim,), jnp.float32) * 0.1             # lp bias
    w_router = jax.random.normal(k4, (ne, hidden_dim), jnp.float32) * 0.1      # router (bias=False)
    hps = jax.random.normal(k5, (ne, hidden_dim, out_dim), jnp.float32) * 0.1  # expert weight bank

    ref = lily_adapter_reference(x, w_lp, b_lp, w_router, hps, mlp=False)

    # Production config: bf16 compute (f32 MXU accumulation) + bf16 output writeback.
    out_bf16 = lily_adapter_forward(x, w_lp, b_lp, w_router, hps, mlp=False,
                                    compute_dtype=jnp.bfloat16, out_dtype=jnp.bfloat16)
    out_bf16 = jax.block_until_ready(out_bf16)
    assert out_bf16.shape == (B, S, out_dim)
    assert out_bf16.dtype == jnp.bfloat16
    assert jnp.allclose(out_bf16.astype(jnp.float32), ref, atol=2e-2, rtol=2e-2), \
        "bf16 kernel mismatch vs reference"

    # f32 compute path: tight-tolerance correctness check of the kernel structure.
    out_f32 = lily_adapter_forward(x, w_lp, b_lp, w_router, hps, mlp=False,
                                   compute_dtype=jnp.float32)
    out_f32 = jax.block_until_ready(out_f32)
    assert out_f32.shape == (B, S, out_dim)
    assert out_f32.dtype == jnp.float32
    assert jnp.allclose(out_f32, ref, atol=1e-4, rtol=1e-4), "f32 kernel mismatch vs reference"

    # mlp=True (ReLU non-linearity) path.
    ref_relu = lily_adapter_reference(x, w_lp, b_lp, w_router, hps, mlp=True)
    out_relu = lily_adapter_forward(x, w_lp, b_lp, w_router, hps, mlp=True,
                                    compute_dtype=jnp.float32)
    out_relu = jax.block_until_ready(out_relu)
    assert jnp.allclose(out_relu, ref_relu, atol=1e-4, rtol=1e-4), "relu kernel mismatch"

    print("KERNEL_OK")
</pallas_src>

<mosaic_0001>
module attributes {stable_mosaic.version = 11 : i64} {
  func.func @_stage1_kernel(%arg0: i32, %arg1: memref<16x16xf32, #tpu.memory_space<vmem>>, %arg2: memref<16x32xbf16, #tpu.memory_space<vmem>>, %arg3: memref<1x32xf32, #tpu.memory_space<vmem>>, %arg4: memref<32x128xbf16, #tpu.memory_space<vmem>>, %arg5: memref<16x32xbf16, #tpu.memory_space<vmem>>, %arg6: memref<1x1x128xf32, #tpu.memory_space<vmem>>) attributes {dimension_semantics = [#tpu.dimension_semantics<parallel>], iteration_bounds = array<i64: 1>, scalar_prefetch = 0 : i64, scratch_operands = 0 : i64, tpu.core_type = #tpu.core_type<tc>, window_params = [{transform_indices = @transform_0, window_bounds = array<i64: 16, 16>}, {pipeline_mode = #tpu.pipeline_mode<synchronous>, transform_indices = @transform_1, window_bounds = array<i64: 16, 32>}, {pipeline_mode = #tpu.pipeline_mode<synchronous>, transform_indices = @transform_2, window_bounds = array<i64: 1, 32>}, {pipeline_mode = #tpu.pipeline_mode<synchronous>, transform_indices = @transform_3, window_bounds = array<i64: 32, 128>}, {transform_indices = @transform_4, window_bounds = array<i64: 16, 32>}, {transform_indices = @transform_5, window_bounds = array<i64: 1, 1, 128>}]} {
    %c0 = arith.constant 0 : index
    %c0_0 = arith.constant 0 : index
    %0 = vector.load %arg1[%c0, %c0_0] : memref<16x16xf32, #tpu.memory_space<vmem>>, vector<16x16xf32>
    %1 = arith.truncf %0 : vector<16x16xf32> to vector<16x16xbf16>
    %c0_1 = arith.constant 0 : index
    %c0_2 = arith.constant 0 : index
    %2 = vector.load %arg2[%c0_1, %c0_2] : memref<16x32xbf16, #tpu.memory_space<vmem>>, vector<16x32xbf16>
    %cst = arith.constant dense<0.000000e+00> : vector<16x32xf32>
    %3 = tpu.matmul %1, %2, %cst {dimension_numbers = #tpu.dot_dimension_numbers<[1], [0], [0], [1], [0, 0, 1, 1], [], []>} : vector<16x16xbf16>, vector<16x32xbf16>, vector<16x32xf32> -> vector<16x32xf32>
    %c0_3 = arith.constant 0 : index
    %c0_4 = arith.constant 0 : index
    %4 = vector.load %arg3[%c0_3, %c0_4] : memref<1x32xf32, #tpu.memory_space<vmem>>, vector<1x32xf32>
    %5 = vector.broadcast %4 : vector<1x32xf32> to vector<16x32xf32>
    %6 = arith.addf %3, %5 : vector<16x32xf32>
    %7 = arith.truncf %6 : vector<16x32xf32> to vector<16x32xbf16>
    %c0_5 = arith.constant 0 : index
    %c0_6 = arith.constant 0 : index
    %8 = vector.load %arg5[%c0_5, %c0_6] : memref<16x32xbf16, #tpu.memory_space<vmem>>, vector<16x32xbf16>
    tpu.vector_store %arg5[%c0_5, %c0_6], %7 {strides = array<i32>} : memref<16x32xbf16, #tpu.memory_space<vmem>>, vector<16x32xbf16>,
    %c0_7 = arith.constant 0 : index
    %c0_8 = arith.constant 0 : index
    %9 = vector.load %arg4[%c0_7, %c0_8] : memref<32x128xbf16, #tpu.memory_space<vmem>>, vector<32x128xbf16>
    %cst_9 = arith.constant dense<0.000000e+00> : vector<16x128xf32>
    %10 = tpu.matmul %7, %9, %cst_9 {dimension_numbers = #tpu.dot_dimension_numbers<[1], [0], [0], [1], [0, 0, 1, 1], [], []>} : vector<16x32xbf16>, vector<32x128xbf16>, vector<16x128xf32> -> vector<16x128xf32>
    %11 = tpu.iota {dimensions = array<i32: 1>} : vector<16x128xi32>
    %c4_i32 = arith.constant 4 : i32
    %12 = vector.broadcast %c4_i32 : i32 to vector<16x128xi32>
    %13 = arith.cmpi slt, %11, %12 : vector<16x128xi32>
    %cst_10 = arith.constant -1.000000e+30 : f32
    %14 = vector.broadcast %cst_10 : f32 to vector<16x128xf32>
    %15 = arith.select %13, %10, %14 : vector<16x128xi1>, vector<16x128xf32>
    %cst_11 = arith.constant dense<0xFF800000> : vector<16xf32>
    %16 = vector.multi_reduction <maximumf>, %15, %cst_11 [1] : vector<16x128xf32> to vector<16xf32>
    %17 = vector.shape_cast %16 : vector<16xf32> to vector<16x1xf32>
    %18 = vector.broadcast %17 : vector<16x1xf32> to vector<16x128xf32>
    %19 = arith.subf %15, %18 : vector<16x128xf32>
    %20 = math.exp %19 : vector<16x128xf32>
    %cst_12 = arith.constant dense<0.000000e+00> : vector<16xf32>
    %21 = vector.multi_reduction <add>, %20, %cst_12 [1] : vector<16x128xf32> to vector<16xf32>
    %22 = vector.shape_cast %21 : vector<16xf32> to vector<16x1xf32>
    %23 = tpu.reciprocal %22 {approx = true} : vector<16x1xf32> -> vector<16x1xf32>
    %24 = vector.broadcast %23 : vector<16x1xf32> to vector<16x128xf32>
    %25 = arith.mulf %20, %24 : vector<16x128xf32>
    %cst_13 = arith.constant dense<0.000000e+00> : vector<128xf32>
    %26 = vector.multi_reduction <add>, %25, %cst_13 [0] : vector<16x128xf32> to vector<128xf32>
    %27 = vector.shape_cast %26 : vector<128xf32> to vector<1x1x128xf32>
    %c0_14 = arith.constant 0 : index
    %c0_15 = arith.constant 0 : index
    %c0_16 = arith.constant 0 : index
    %28 = vector.load %arg6[%c0_14, %c0_15, %c0_16] : memref<1x1x128xf32, #tpu.memory_space<vmem>>, vector<1x1x128xf32>
    tpu.vector_store %arg6[%c0_14, %c0_15, %c0_16], %27 {strides = array<i32>} : memref<1x1x128xf32, #tpu.memory_space<vmem>>, vector<1x1x128xf32>,
    return
  }
  func.func @transform_0(%arg0: i32) -> (i32, i32) {
    %c0_i32 = arith.constant 0 : i32
    %c0_i32_0 = arith.constant 0 : i32
    return %arg0, %c0_i32 : i32, i32
  }
  func.func @transform_1(%arg0: i32) -> (i32, i32) {
    %c0_i32 = arith.constant 0 : i32
    %c0_i32_0 = arith.constant 0 : i32
    %c0_i32_1 = arith.constant 0 : i32
    return %c0_i32, %c0_i32_0 : i32, i32
  }
  func.func @transform_2(%arg0: i32) -> (i32, i32) {
    %c0_i32 = arith.constant 0 : i32
    %c0_i32_0 = arith.constant 0 : i32
    %c0_i32_1 = arith.constant 0 : i32
    return %c0_i32, %c0_i32_0 : i32, i32
  }
  func.func @transform_3(%arg0: i32) -> (i32, i32) {
    %c0_i32 = arith.constant 0 : i32
    %c0_i32_0 = arith.constant 0 : i32
    %c0_i32_1 = arith.constant 0 : i32
    return %c0_i32, %c0_i32_0 : i32, i32
  }
  func.func @transform_4(%arg0: i32) -> (i32, i32) {
    %c0_i32 = arith.constant 0 : i32
    %c0_i32_0 = arith.constant 0 : i32
    return %arg0, %c0_i32 : i32, i32
  }
  func.func @transform_5(%arg0: i32) -> (i32, i32, i32) {
    %c0_i32 = arith.constant 0 : i32
    %c0_i32_0 = arith.constant 0 : i32
    %c0_i32_1 = arith.constant 0 : i32
    return %arg0, %c0_i32, %c0_i32_0 : i32, i32, i32
  }
}

</mosaic_0001>

<bundles_post_ra>
// kernel: tpu_custom_call.1
= control target key start
LH: loop header
LB: loop body
LE: loop exit
PB: predicated region body
PF: predicated region fallthrough
CT: control target
= control target key end

     0   :  { %11 = vsyncpa [#allocation3], 0  ;;  %s442_s0 = inlined_call_operand.hbm [shape: f32[16,16], index: 0, kind: input, shape index: {}]   ;;  %s443_s1 = inlined_call_operand.hbm [shape: bf16[16,32], index: 1, kind: input, shape index: {}]   ;;  %s444_s2 = inlined_call_operand.vmem [shape: f32[1,32], index: 2, kind: input, shape index: {}]   ;;  %s445_s3 = inlined_call_operand.hbm [shape: bf16[32,128], index: 3, kind: input, shape index: {}]   ;;  %s446_s4 = inlined_call_operand.hbm [shape: bf16[16,32], index: 4, kind: output, shape index: {0}]   ;;  %s447_s5 = inlined_call_operand.hbm [shape: f32[1,1,128], index: 5, kind: output, shape index: {1}]  }
   0x1   :  { %12 = vsyncpa [#allocation6], 0 }
   0x2   :  { %13 = vsyncpa [#allocation4], 0  ;;  %s32_s20 = sshll.u32 %s443_s1, 4  ;;  %s33_s20 = int_to_ptr.hbm [resolvable:$true] %s32_s20 }
   0x3   :  { %14 = vsyncpa [#allocation10], 0  ;;  %s376_s21 = smov [#allocation5]   ;;  %s19_s25 = sshll.u32 %s442_s0, 4  ;;  %s20_s25 = int_to_ptr.hbm [resolvable:$true] %s19_s25 }
   0x4   :  { %s34_s22 = sshll.u32 %s376_s21, 4  ;;  %s377_s26 = smov 64   ;;  %s35_s22 = int_to_ptr.vmem [resolvable:$true] %s34_s22 }
   0x5   :  { %s378_s27 = smov 4   ;;  %s379_s28 = smov [#allocation2]  }
   0x6   :  { %40 = dma.hbm_to_vmem [thread:$0]  %s33_s20, 128, %s35_s22, [#allocation6], %s377_s26, %s377_s26, %s378_s27  }
   0x7   :  { %s21_s29 = sshll.u32 %s379_s28, 4  ;;  %s380_s1 = smov 128   ;;  %s22_s29 = int_to_ptr.vmem [resolvable:$true] %s21_s29 }
   0x8   :  { %s381_s30 = smov 8   ;;  %s47_s8 = sshll.u32 %s445_s3, 4  ;;  %s48_s8 = int_to_ptr.hbm [resolvable:$true] %s47_s8 }
   0x9   :  { %27 = dma.hbm_to_vmem [thread:$0]  %s20_s25, 256, %s22_s29, [#allocation3], %s380_s1, %s380_s1, %s381_s30  }
   0xa   :  { %s382_s9 = smov [#allocation7]  }
   0xb   :  { %s49_s0 = sshll.u32 %s382_s9, 4  ;;  %s50_s0 = int_to_ptr.vmem [resolvable:$true] %s49_s0 }
   0xc   :  { %55 = dma.hbm_to_vmem [thread:$0]  %s48_s8, 256, %s50_s0, [#allocation6], %s377_s26, %s377_s26, %s378_s27  }
   0xd   :  { %368 = dma.done.wait [#allocation3], 256  }
   0xe   :  { %369 = vsyncadd [#allocation3], 4294967040 }
   0xf   :  { %370 = dma.done.wait [#allocation6], 384  }
  0x10   :  { %371 = vsyncadd [#allocation6], 4294966912  ;;  %v227_v0 = vld [vmem:[#allocation5] sm:$0xff]  ;;  %v69_v1 = vld [vmem:[#allocation2] sm:$0xff]  ;;  %vm84_vm0 = vcmask 130048   ;;  %vm104_vm1 = vcmask 257024   ;;  %v146_v16 = vlaneseq }
  0x11   :  { %v70_v2 = vld [vmem:[#allocation2 + $0x8] sm:$0xff]  ;;  %95 = vmatpush.bf16.msra.mxu0 %v227_v0  ;;  %v229_v4 = vld [vmem:[#allocation7 + $0x8] sm:$0xff]  ;;  %v228_v5 = vld [vmem:[#allocation7] sm:$0xff]  ;;  %vm128_vm2 = vcmask 261120   ;;  %s183_s12 = sshll.u32 %s446_s4, 4  ;;  %s383_s13 = smov [#allocation8]   ;;  %s184_s12 = int_to_ptr.hbm [resolvable:$true] %s183_s12 }
  0x12   :  { %v71_v3 = vpack.c.bf16 %v70_v2, %v69_v1  ;;  %138 = vmatpush.bf16.msra.mxu1 %v229_v4  ;;  %v239_v6 = vld [vmem:[%s444_s2] ss:$0 sm:$0xff]  ;;  %v147_v17 = vand.u32 127, %v146_v16  ;;  %s181_s14 = sshll.u32 %s383_s13, 4  ;;  %s384_s4 = smov [#allocation9]   ;;  %s182_s14 = int_to_ptr.vmem [resolvable:$true] %s181_s14 }
  0x13   :  { %s195_s15 = sshll.u32 %s384_s4, 4  ;;  %s197_s18 = sshll.u32 %s447_s5, 4  ;;  %s196_s15 = int_to_ptr.vmem [resolvable:$true] %s195_s15  ;;  %s198_s18 = int_to_ptr.hbm [resolvable:$true] %s197_s18 }
  0x14   :  { %217 = vmatmul.msk.bf16.vlgmr.msra.gmra.mxu0 %vm84_vm0, %v71_v3  ;;  %vm148_vm3 = vcmp.lt.s32.totalorder %v147_v17, 4 }
  0x16   :  { %139 = vmatpush.bf16.msra.mxu1 %v228_v5 }
  0x91   :  { %v97_v7 = vpop.f32.mrf.mxu0 }
  0x92   :  { %v98_v8 = vadd.f32 %v239_v6, %v97_v7 }
  0x94   :  { %v102_v9 = vpack.c.bf16 %v98_v8, %v98_v8 }
  0x96   :  { %105 = vst.msk [vmem:[#allocation8] sm:$0xf] %vm104_vm1, %v102_v9  ;;  %v113_v13 = vunpack.c.l.b16 %v102_v9 }
  0x99   :  { %v99_v10 = vpop.f32.mrf.mxu0 }
  0x9a   :  { %v100_v11 = vadd.f32 %v239_v6, %v99_v10 }
  0x9c   :  { %v103_v12 = vpack.c.bf16 %v100_v11, %v100_v11 }
  0x9e   :  { %106 = vst.msk [vmem:[#allocation8 + $0x4] sm:$0xf] %vm104_vm1, %v103_v12  ;;  %v114_v14 = vunpack.c.l.b16 %v103_v12 }
  0x9f   :  { %189 = dma.vmem_to_hbm [thread:$0]  %s182_s14, 128, %s184_s12, [#allocation4], %s377_s26, %s377_s26, %s378_s27  }
  0xa0   :  { %v115_v15 = vpack.c.b16 %v114_v14, %v113_v13 }
  0xa2   :  { %226 = vmatmul.msk.bf16.vlgmr.msra.gmra.mxu1 %vm128_vm2, %v115_v15 }
 0x11f   :  { %v141_v18 = vpop.f32.mrf.mxu1 }
 0x120   :  { %v149_v19 = vsel %vm148_vm3, %v141_v18, -1e+30 }
 0x121   :  { %151 = vmax.xlane.f32.xlu0 %v149_v19 }
 0x127   :  { %v143_v20 = vpop.f32.mrf.mxu1 }
 0x128   :  { %v150_v21 = vsel %vm148_vm3, %v143_v20, -1e+30 }
 0x129   :  { %153 = vmax.xlane.f32.xlu0 %v150_v21 }
 0x194   :  { %v152_v22 = vpop.xlane.xlu0 %151 }
 0x195   :  { %v155_v23 = vsub.f32 %v149_v19, %v152_v22 }
 0x197   :  { %v157_v24 = vmul.f32 1.442695, %v155_v23 }
 0x199   :  { %240 = vpow2.f32 %v157_v24 }
 0x19c   :  { %v154_v25 = vpop.xlane.xlu0 %153 }
 0x19d   :  { %v156_v26 = vsub.f32 %v150_v21, %v154_v25 }
 0x19f   :  { %v241_v27 = vpop.eup %240  ;;  %v159_v28 = vmul.f32 1.442695, %v156_v26 }
 0x1a0   :  { %161 = vadd.xlane.f32.xlu1 %v241_v27 }
 0x1a1   :  { %242 = vpow2.f32 %v159_v28 }
 0x1a7   :  { %v243_v29 = vpop.eup %242 }
 0x1a8   :  { %163 = vadd.xlane.f32.xlu1 %v243_v29 }
 0x213   :  { %v162_v30 = vpop.xlane.xlu1 %161 }
 0x214   :  { %244 = vrcp.f32 %v162_v30 }
 0x21a   :  { %v245_v32 = vpop.eup %244 }
 0x21b   :  { %v164_v31 = vpop.xlane.xlu1 %163  ;;  %v167_v34 = vmul.f32 %v245_v32, %v241_v27 }
 0x21c   :  { %246 = vrcp.f32 %v164_v31 }
 0x222   :  { %v247_v33 = vpop.eup %246 }
 0x223   :  { %v168_v35 = vmul.f32 %v247_v33, %v243_v29 }
 0x225   :  { %v169_v36 = vadd.f32 %v168_v35, %v167_v34 }
 0x227   :  { %v170_v37 = vrot.slane %v169_v36, 4 }
 0x229   :  { %v171_v38 = vadd.f32 %v170_v37, %v169_v36 }
 0x22b   :  { %v172_v39 = vrot.slane %v171_v38, 2 }
 0x22d   :  { %v173_v40 = vadd.f32 %v172_v39, %v171_v38 }
 0x22f   :  { %v174_v41 = vrot.slane %v173_v40, 1 }
 0x231   :  { %v175_v42 = vadd.f32 %v174_v41, %v173_v40 }
 0x233   :  { %176 = vst [vmem:[#allocation9] sm:$0x1] %v175_v42 }
 0x234   :  { %200 = dma.vmem_to_hbm [thread:$0]  %s196_s15, 16, %s198_s18, [#allocation10]  }
 0x235   :  { %372 = dma.done.wait [#allocation4], 128  }
 0x236   :  { %373 = vsyncadd [#allocation4], 4294967168 }
 0x237   :  { %374 = dma.done.wait [#allocation10], 16  }
 0x238   :  { %375 = vsyncadd [#allocation10], 4294967280 }
 0x239   :  { %209 = vsyncpa [#allocation3], 1 }
 0x23a   :  { %210 = vsyncpa [#allocation6], 1 }
 0x23b   :  { %211 = vsyncpa [#allocation4], 1 }
 0x23c   :  { %212 = vsyncpa [#allocation10], 1 }

</bundles_post_ra>
